<compile_context>
chip_gen: v6e
topology: v6e:2x2x1
jax: 0.10.0
libtpu: 0.0.40
codegen_flags: <defaults>
</compile_context>

<pallas_src>
import jax
import jax.numpy as jnp
from jax.experimental import pallas as pl
from jax.experimental.pallas import tpu as pltpu

LANES = 128
INPUT_VMEM_BUDGET = 16 * 1024 * 1024   # both inputs, double-buffered
SMOOTH = 1.0


def _make_dice_kernel(rows_total, block_rows, needs_mask):
    """Kernel computing per-block partial sums: (sum(p*y), sum(p), sum(y))."""

    def kernel(x_ref, y_ref, o_ref):
        x = x_ref[...].astype(jnp.float32)
        y = y_ref[...].astype(jnp.float32)
        # sigmoid(x) == 0.5*tanh(0.5*x) + 0.5  -> one EUP op per element.
        p = 0.5 * jnp.tanh(0.5 * x) + 0.5

        if needs_mask:
            # Rows past rows_total in the last block hold unspecified data
            # (the block extends past the array edge) -> zero them out.
            base = pl.program_id(0) * block_rows
            row_ids = base + jax.lax.broadcasted_iota(jnp.int32, x.shape, 0)
            valid = row_ids < rows_total
            p = jnp.where(valid, p, 0.0)
            y = jnp.where(valid, y, 0.0)

        # Reduce only over the row (sublane) axis; keep a lane-dense (1,128)
        # partial per quantity. The final cross-lane reduce happens once in the
        # wrapper on a tiny tensor.
        inter = jnp.sum(p * y, axis=0, keepdims=True)   # (1, LANES)
        psum = jnp.sum(p, axis=0, keepdims=True)        # (1, LANES)
        ysum = jnp.sum(y, axis=0, keepdims=True)        # (1, LANES)

        o_ref[0] = jnp.concatenate([inter, psum, ysum], axis=0)  # (3, LANES)

    return kernel


def dice_loss(logits, labels):
    """1 - (2*sum(sigmoid(l)*y) + 1) / (sum(sigmoid(l)) + sum(y) + 1)."""
    lf = logits.reshape(-1)
    yf = labels.reshape(-1)
    n = lf.shape[0]

    # Only pad when numel is not a multiple of 128 (rare for NCHW tensors);
    # logits padded with a huge negative so sigmoid(pad) == 0 exactly, labels
    # padded with 0, so padding contributes nothing to any sum.
    rem = n % LANES
    if rem != 0:
        # TODO(synk): this is the only remaining full-array copy; it triggers
        # only when numel % 128 != 0.
        pad = LANES - rem
        lf = jnp.pad(lf, (0, pad), constant_values=-1e30)
        yf = jnp.pad(yf, (0, pad), constant_values=0)

    rows_total = lf.shape[0] // LANES
    x2d = lf.reshape(rows_total, LANES)
    y2d = yf.reshape(rows_total, LANES)

    # Adaptive fat tile: size the row-tile by input dtype so the two
    # double-buffered input blocks fit in ~16 MiB of VMEM regardless of
    # f32/bf16 mix, shrunk for small inputs (multiple of 8 sublanes).
    bytes_per_row = LANES * (x2d.dtype.itemsize + y2d.dtype.itemsize)
    max_rows = max(8, ((INPUT_VMEM_BUDGET // (2 * bytes_per_row)) // 8) * 8)
    block_rows = min(max_rows, ((rows_total + 7) // 8) * 8)
    num_blocks = -(-rows_total // block_rows)
    needs_mask = (rows_total % block_rows) != 0

    kernel = _make_dice_kernel(rows_total, block_rows, needs_mask)

    n_elems = rows_total * LANES
    cost = pl.CostEstimate(
        flops=8 * n_elems,
        transcendentals=n_elems,
        bytes_accessed=(
            x2d.size * x2d.dtype.itemsize
            + y2d.size * y2d.dtype.itemsize
            + num_blocks * 3 * LANES * 4
        ),
    )

    partials = pl.pallas_call(
        kernel,
        out_shape=jax.ShapeDtypeStruct((num_blocks, 3, LANES), jnp.float32),
        grid_spec=pltpu.PrefetchScalarGridSpec(
            num_scalar_prefetch=0,
            grid=(num_blocks,),
            in_specs=[
                pl.BlockSpec((block_rows, LANES), lambda i: (i, 0)),
                pl.BlockSpec((block_rows, LANES), lambda i: (i, 0)),
            ],
            out_specs=pl.BlockSpec((1, 3, LANES), lambda i: (i, 0, 0)),
        ),
        compiler_params=pltpu.CompilerParams(
            dimension_semantics=("parallel",),
            vmem_limit_bytes=32 * 1024 * 1024,
        ),
        cost_estimate=cost,
    )(x2d, y2d)

    sums = jnp.sum(partials, axis=(0, 2))          # (3,): inter, sum(p), sum(y)
    inter, psum, ysum = sums[0], sums[1], sums[2]
    return 1.0 - (2.0 * inter + SMOOTH) / (psum + ysum + SMOOTH)


if __name__ == "__main__":
    key = jax.random.PRNGKey(0)
    k1, k2 = jax.random.split(key)
    # Small shapes consistent with a segmentation-style loss: NCHW logits/labels.
    logits = jax.random.normal(k1, (2, 4, 16, 16), dtype=jnp.float32)
    labels = (jax.random.uniform(k2, (2, 4, 16, 16)) > 0.5).astype(jnp.float32)

    loss = jax.block_until_ready(dice_loss(logits, labels))

    # Pure-JAX reference check (same math as the PyTorch module).
    p = jax.nn.sigmoid(logits).reshape(-1)
    y = labels.reshape(-1)
    ref = 1.0 - (2.0 * jnp.sum(p * y) + SMOOTH) / (jnp.sum(p) + jnp.sum(y) + SMOOTH)
    assert abs(float(loss) - float(ref)) < 1e-5, (float(loss), float(ref))

    print("KERNEL_OK")
</pallas_src>

<mosaic_0001>
module attributes {stable_mosaic.version = 11 : i64} {
  func.func @kernel(%arg0: i32, %arg1: memref<16x128xf32, #tpu.memory_space<vmem>>, %arg2: memref<16x128xf32, #tpu.memory_space<vmem>>, %arg3: memref<1x3x128xf32, #tpu.memory_space<vmem>>) attributes {dimension_semantics = [#tpu.dimension_semantics<parallel>], iteration_bounds = array<i64: 1>, scalar_prefetch = 0 : i64, scratch_operands = 0 : i64, tpu.core_type = #tpu.core_type<tc>, window_params = [{transform_indices = @transform_0, window_bounds = array<i64: 16, 128>}, {transform_indices = @transform_1, window_bounds = array<i64: 16, 128>}, {transform_indices = @transform_2, window_bounds = array<i64: 1, 3, 128>}]} {
    %c0 = arith.constant 0 : index
    %c0_0 = arith.constant 0 : index
    %0 = vector.load %arg1[%c0, %c0_0] : memref<16x128xf32, #tpu.memory_space<vmem>>, vector<16x128xf32>
    %c0_1 = arith.constant 0 : index
    %c0_2 = arith.constant 0 : index
    %1 = vector.load %arg2[%c0_1, %c0_2] : memref<16x128xf32, #tpu.memory_space<vmem>>, vector<16x128xf32>
    %cst = arith.constant 5.000000e-01 : f32
    %2 = vector.broadcast %cst : f32 to vector<16x128xf32>
    %3 = arith.mulf %2, %0 : vector<16x128xf32>
    %4 = math.tanh %3 : vector<16x128xf32>
    %cst_3 = arith.constant 5.000000e-01 : f32
    %5 = vector.broadcast %cst_3 : f32 to vector<16x128xf32>
    %6 = arith.mulf %5, %4 : vector<16x128xf32>
    %cst_4 = arith.constant 5.000000e-01 : f32
    %7 = vector.broadcast %cst_4 : f32 to vector<16x128xf32>
    %8 = arith.addf %6, %7 : vector<16x128xf32>
    %9 = arith.mulf %8, %1 : vector<16x128xf32>
    %cst_5 = arith.constant dense<0.000000e+00> : vector<128xf32>
    %10 = vector.multi_reduction <add>, %9, %cst_5 [0] : vector<16x128xf32> to vector<128xf32>
    %11 = vector.shape_cast %10 : vector<128xf32> to vector<1x128xf32>
    %cst_6 = arith.constant dense<0.000000e+00> : vector<128xf32>
    %12 = vector.multi_reduction <add>, %8, %cst_6 [0] : vector<16x128xf32> to vector<128xf32>
    %13 = vector.shape_cast %12 : vector<128xf32> to vector<1x128xf32>
    %cst_7 = arith.constant dense<0.000000e+00> : vector<128xf32>
    %14 = vector.multi_reduction <add>, %1, %cst_7 [0] : vector<16x128xf32> to vector<128xf32>
    %15 = vector.shape_cast %14 : vector<128xf32> to vector<1x128xf32>
    %16 = tpu.concatenate %11, %13, %15 in 0 : vector<1x128xf32>, vector<1x128xf32>, vector<1x128xf32> -> vector<3x128xf32>
    %c0_8 = arith.constant 0 : index
    %c0_9 = arith.constant 0 : index
    %c0_10 = arith.constant 0 : index
    %17 = vector.load %arg3[%c0_8, %c0_9, %c0_10] : memref<1x3x128xf32, #tpu.memory_space<vmem>>, vector<1x3x128xf32>
    %18 = vector.shape_cast %17 : vector<1x3x128xf32> to vector<3x128xf32>
    %19 = vector.shape_cast %16 : vector<3x128xf32> to vector<1x3x128xf32>
    tpu.vector_store %arg3[%c0_8, %c0_9, %c0_10], %19 {strides = array<i32>} : memref<1x3x128xf32, #tpu.memory_space<vmem>>, vector<1x3x128xf32>,
    return
  }
  func.func @transform_0(%arg0: i32) -> (i32, i32) {
    %c0_i32 = arith.constant 0 : i32
    %c0_i32_0 = arith.constant 0 : i32
    return %arg0, %c0_i32 : i32, i32
  }
  func.func @transform_1(%arg0: i32) -> (i32, i32) {
    %c0_i32 = arith.constant 0 : i32
    %c0_i32_0 = arith.constant 0 : i32
    return %arg0, %c0_i32 : i32, i32
  }
  func.func @transform_2(%arg0: i32) -> (i32, i32, i32) {
    %c0_i32 = arith.constant 0 : i32
    %c0_i32_0 = arith.constant 0 : i32
    %c0_i32_1 = arith.constant 0 : i32
    return %arg0, %c0_i32, %c0_i32_0 : i32, i32, i32
  }
}

</mosaic_0001>

<bundles_post_ra>
// kernel: tpu_custom_call.1
= control target key start
LH: loop header
LB: loop body
LE: loop exit
PB: predicated region body
PF: predicated region fallthrough
CT: control target
= control target key end

     0   :  { %7 = vsyncpa [#allocation3], 0  ;;  %s165_s0 = inlined_call_operand.hbm [shape: f32[16,128], index: 0, kind: input, shape index: {}]   ;;  %s166_s1 = inlined_call_operand.hbm [shape: f32[16,128], index: 1, kind: input, shape index: {}]   ;;  %s167_s2 = inlined_call_operand.vmem [shape: f32[1,3,128], index: 2, kind: output, shape index: {}]  }
   0x1   :  { %8 = vsyncpa [#allocation5], 0  ;;  %s137_s9 = smov [#allocation2]  }
   0x2   :  { %s14_s10 = sshll.u32 %s137_s9, 4  ;;  %s15_s10 = int_to_ptr.vmem [resolvable:$true] %s14_s10 }
   0x3   :  { %s101_s11 = scalar_lea.vmem %s15_s10, 256  ;;  %p106_p1 = scmp.lt.s32.totalorder %s15_s10, %s15_s10 }
   0x4   :  { %p102_p0 = scmp.ne.s32.totalorder %s15_s10, %s101_s11  ;;  %p107_p2 = scmp.lt.s32.totalorder %s101_s11, %s101_s11 }
   0x6   :  { %p108_p3 = por %p107_p2, %p106_p1 }
   0x8   :  { %p109_p4 = pnand %p108_p3, %p102_p0 }
   0xa   :  { %112 = shalt.err (!%p109_p4)
}
   0xb   :  { %s138_s12 = smov 128   ;;  %s139_s13 = smov 8  }
   0xc   :  { %20 = dma.hbm_to_vmem [thread:$0]  %s165_s0, 256, %s15_s10, [#allocation3], %s138_s12, %s138_s12, %s139_s13  }
   0xd   :  { %s140_s16 = smov [#allocation4]  }
   0xe   :  { %s26_s17 = sshll.u32 %s140_s16, 4  ;;  %s27_s17 = int_to_ptr.vmem [resolvable:$true] %s26_s17 }
   0xf   :  { %s121_s18 = scalar_lea.vmem %s27_s17, 256  ;;  %p126_p6 = scmp.lt.s32.totalorder %s27_s17, %s27_s17 }
  0x10   :  { %p122_p5 = scmp.ne.s32.totalorder %s27_s17, %s121_s18  ;;  %p127_p7 = scmp.lt.s32.totalorder %s121_s18, %s121_s18 }
  0x12   :  { %p128_p8 = por %p127_p7, %p126_p6 }
  0x14   :  { %p129_p9 = pnand %p128_p8, %p122_p5 }
  0x16   :  { %132 = shalt.err (!%p129_p9)
}
  0x17   :  { %32 = dma.hbm_to_vmem [thread:$0]  %s166_s1, 256, %s27_s17, [#allocation5], %s138_s12, %s138_s12, %s139_s13  }
  0x18   :  { %133 = dma.done.wait [#allocation3], 256  }
  0x19   :  { %134 = vsyncadd [#allocation3], 4294967040 }
  0x1a   :  { %135 = dma.done.wait [#allocation5], 256  }
  0x1b   :  { %136 = vsyncadd [#allocation5], 4294967040  ;;  %v39_v0 = vld [vmem:[#allocation2] sm:$0xff]  ;;  %v40_v1 = vld [vmem:[#allocation2 + $0x8] sm:$0xff]  ;;  %vm74_vm0 = vcmask 1040384   ;;  %vm76_vm1 = vcmask 1041408  }
  0x1c   :  { %v43_v2 = vmul.f32 0.5, %v39_v0  ;;  %v44_v3 = vmul.f32 0.5, %v40_v1  ;;  %v41_v4 = vld [vmem:[#allocation4] sm:$0xff]  ;;  %v42_v5 = vld [vmem:[#allocation4 + $0x8] sm:$0xff] }
  0x1d   :  { %v67_v6 = vadd.f32 %v42_v5, %v41_v4 }
  0x1e   :  { %89 = vtanh.f32 %v43_v2 }
  0x1f   :  { %91 = vtanh.f32 %v44_v3  ;;  %v68_v7 = vrot.slane %v67_v6, 4 }
  0x21   :  { %v69_v13 = vadd.f32 %v68_v7, %v67_v6 }
  0x23   :  { %v70_v18 = vrot.slane %v69_v13, 2 }
  0x25   :  { %v71_v23 = vadd.f32 %v70_v18, %v69_v13 }
  0x27   :  { %v72_v28 = vrot.slane %v71_v23, 1 }
  0x29   :  { %v73_v33 = vadd.f32 %v72_v28, %v71_v23 }
  0x2b   :  { %v90_v8 = vpop.eup %89 }
  0x2c   :  { %v92_v9 = vpop.eup %91  ;;  %v47_v10 = vmul.f32 0.5, %v90_v8 }
  0x2d   :  { %v48_v11 = vmul.f32 0.5, %v92_v9 }
  0x2e   :  { %v49_v12 = vadd.f32 0.5, %v47_v10 }
  0x2f   :  { %v50_v14 = vadd.f32 0.5, %v48_v11 }
  0x30   :  { %v51_v15 = vmul.f32 %v49_v12, %v41_v4 }
  0x31   :  { %v52_v16 = vmul.f32 %v50_v14, %v42_v5  ;;  %v60_v17 = vadd.f32 %v50_v14, %v49_v12 }
  0x33   :  { %v53_v19 = vadd.f32 %v52_v16, %v51_v15  ;;  %v61_v20 = vrot.slane %v60_v17, 4 }
  0x35   :  { %v54_v21 = vrot.slane %v53_v19, 4  ;;  %v62_v22 = vadd.f32 %v61_v20, %v60_v17 }
  0x37   :  { %v55_v24 = vadd.f32 %v54_v21, %v53_v19  ;;  %v63_v25 = vrot.slane %v62_v22, 2 }
  0x39   :  { %v56_v26 = vrot.slane %v55_v24, 2  ;;  %v64_v27 = vadd.f32 %v63_v25, %v62_v22 }
  0x3b   :  { %v57_v29 = vadd.f32 %v56_v26, %v55_v24  ;;  %v65_v30 = vrot.slane %v64_v27, 1 }
  0x3d   :  { %v58_v31 = vrot.slane %v57_v29, 1  ;;  %v66_v32 = vadd.f32 %v65_v30, %v64_v27 }
  0x3f   :  { %v59_v34 = vadd.f32 %v58_v31, %v57_v29 }
  0x41   :  { %v75_v35 = vsel %vm74_vm0, %v59_v34, %v66_v32 }
  0x42   :  { %v77_v36 = vsel %vm76_vm1, %v75_v35, %v73_v33 }
  0x43   :  { %78 = vst [vmem:[%s167_s2] sm:$0x7] %v77_v36 }
  0x44   :  { %83 = vsyncpa [#allocation3], 1 }
  0x45   :  { %84 = vsyncpa [#allocation5], 1 }

</bundles_post_ra>
